<compile_context>
chip_gen: v5e
topology: v5e:2x2
jax: 0.10.0
libtpu: 0.0.40
codegen_flags: <defaults>
</compile_context>

<pallas_src>
import math

import jax
import jax.numpy as jnp
from jax import lax
from jax.experimental import pallas as pl
from jax.experimental.pallas import tpu as pltpu


def _round_up(x: int, m: int) -> int:
    return ((x + m - 1) // m) * m


def _cdiv(a: int, b: int) -> int:
    return -(-a // b)


def _tpu_vmem_and_cores():
    """Best-effort query of physical VMEM bytes and TensorCore count."""
    vmem_cap = 64 << 20      # conservative fallback (v7x per-TC VMEM)
    cores = 1
    try:
        info = pltpu.get_tpu_info()
        vmem_cap = int(getattr(info, "vmem_capacity_bytes", vmem_cap))
        for name in ("num_cores", "tensorcore_count", "num_tensorcores",
                     "core_count"):
            v = getattr(info, name, None)
            if v:
                cores = int(v)
                break
    except Exception:
        pass
    return vmem_cap, cores


# ----------------------------------------------------------------------------
# Kernels
# ----------------------------------------------------------------------------
def _encode_decode_step(x_ref, w_enc_t_ref, b_enc_ref, w_dec_ref, fx_ref):
    """Shared per-(i,k) work: encoder slice, ReLU, f_x store, decoder partial."""
    # Cast the activation tile to the weight dtype so the MXU sees matching
    # (bf16 x bf16) operands; accumulation is f32 via preferred_element_type.
    x_blk = x_ref[...].astype(w_enc_t_ref.dtype)
    # Encoder: (tb, d_vit) . (tsae, d_vit)^T -> (tb, tsae); W_enc is stored
    # transposed so this block is a contiguous HBM slab.
    h_pre = lax.dot_general(
        x_blk, w_enc_t_ref[...],
        dimension_numbers=(((1,), (1,)), ((), ())),
        preferred_element_type=jnp.float32) + b_enc_ref[...]
    f_x = jnp.maximum(h_pre, 0.0)                      # ReLU (config.Relu)
    fx_ref[...] = f_x.astype(fx_ref.dtype)
    # Decoder partial sum: (tb, tsae) . (tsae, d_vit) -> (tb, d_vit), f32.
    return jnp.dot(f_x.astype(w_dec_ref.dtype), w_dec_ref[...],
                   preferred_element_type=jnp.float32)


def sae_fwd_kernel_direct(x_ref, w_enc_t_ref, b_enc_ref, w_dec_ref, b_dec_ref,
                          xhat_ref, fx_ref):
    """x_hat output is f32: accumulate straight into the resident out block."""
    k = pl.program_id(1)

    @pl.when(k == 0)
    def _init():
        xhat_ref[...] = jnp.zeros_like(xhat_ref)

    xhat_ref[...] += _encode_decode_step(x_ref, w_enc_t_ref, b_enc_ref,
                                         w_dec_ref, fx_ref)

    @pl.when(k == pl.num_programs(1) - 1)
    def _finalize():
        xhat_ref[...] += b_dec_ref[...]


def sae_fwd_kernel_scratch(x_ref, w_enc_t_ref, b_enc_ref, w_dec_ref, b_dec_ref,
                           xhat_ref, fx_ref, acc_ref):
    """Generic path: f32 VMEM accumulator, cast to out dtype on the last step."""
    k = pl.program_id(1)

    @pl.when(k == 0)
    def _init():
        acc_ref[...] = jnp.zeros_like(acc_ref)

    acc_ref[...] += _encode_decode_step(x_ref, w_enc_t_ref, b_enc_ref,
                                        w_dec_ref, fx_ref)

    @pl.when(k == pl.num_programs(1) - 1)
    def _finalize():
        xhat_ref[...] = (acc_ref[...] + b_dec_ref[...]).astype(xhat_ref.dtype)


# ----------------------------------------------------------------------------
# Wrapper
# ----------------------------------------------------------------------------
def _vmem_estimate(tb, d_vit, tsae, x_item, w_item, xhat_item, fx_item,
                   use_scratch):
    """Rough VMEM footprint (double-buffered blocks + scratch)."""
    est = 0
    est += 2 * tb * d_vit * x_item         # x tile (resident over k)
    est += 2 * tsae * d_vit * w_item       # W_enc^T row block
    est += 2 * tsae * d_vit * w_item       # W_dec row block
    est += 2 * 8 * tsae * 4                # folded encoder bias (sublane pad)
    est += 2 * 8 * d_vit * 4               # decoder bias
    est += 2 * tb * d_vit * xhat_item      # x_hat out block
    est += 2 * tb * tsae * fx_item         # f_x out block
    if use_scratch:
        est += tb * d_vit * 4              # f32 accumulator scratch
    return est


def sae_forward(x, w_enc, b_enc, w_dec, b_dec, *, tb=None, tsae=1024,
                weight_dtype=jnp.bfloat16, fx_dtype=None, xhat_dtype=None):
    """Pallas SAE forward.

    x: [batch, d_vit]; W_enc: [d_vit, d_sae]; W_dec: [d_sae, d_vit].
    Returns (x_hat [batch, d_vit], f_x [batch, d_sae]).
      weight_dtype: dtype for the streamed weight matrices (None = keep f32).
      fx_dtype / xhat_dtype: output dtypes (None = x.dtype).
      tb: batch tile (None = auto, generation-aware); tsae: d_sae tile.
    """
    batch, d_vit = x.shape
    assert w_enc.shape[0] == d_vit
    d_sae = w_enc.shape[1]
    assert w_dec.shape == (d_sae, d_vit)
    assert b_enc.shape == (d_sae,)
    assert b_dec.shape == (d_vit,)

    xhat_dt = jnp.dtype(xhat_dtype) if xhat_dtype is not None else jnp.dtype(x.dtype)
    fx_dt = jnp.dtype(fx_dtype) if fx_dtype is not None else jnp.dtype(x.dtype)
    w_dt = jnp.dtype(weight_dtype) if weight_dtype is not None else jnp.dtype(w_enc.dtype)
    use_scratch = xhat_dt != jnp.dtype(jnp.float32)

    vmem_cap, n_cores = _tpu_vmem_and_cores()

    # Fold b_dec into the encoder bias (full precision, done once):
    #   (x - b_dec) @ W_enc + b_enc == x @ W_enc + (b_enc - b_dec @ W_enc)
    b_enc_eff = (b_enc.astype(jnp.float32)
                 - jnp.dot(b_dec.astype(jnp.float32),
                           w_enc.astype(jnp.float32))).reshape(1, d_sae)
    b_dec2 = b_dec.astype(jnp.float32).reshape(1, d_vit)

    # Both streamed weight slabs are [d_sae, d_vit], row-blocked on d_sae
    # (contiguous HBM reads, symmetric layouts).
    w_enc_t = jnp.transpose(w_enc).astype(w_dt)    # [d_sae, d_vit]
    w_dec_c = w_dec.astype(w_dt)                   # [d_sae, d_vit]

    # ---- tile selection -----------------------------------------------------
    # d_sae tile: multiple of 128 lanes, capped at (padded) d_sae.
    tsae = max(128, int(tsae))
    tsae = min(_round_up(tsae, 128), _round_up(d_sae, 128))

    # Batch tile: multiple of 16 sublanes (packed-dtype safe).
    pb_min = _round_up(batch, 16)
    auto_tb = tb is None
    if auto_tb:
        tb = 1024 if vmem_cap > (96 << 20) else 512   # v5e/v6e vs v7x
    tb = max(16, min(_round_up(int(tb), 16), pb_min))

    # Megacore occupancy guard: keep >= n_cores batch tiles when possible.
    if n_cores > 1:
        while _cdiv(pb_min, tb) < n_cores and tb > 16:
            tb = max(16, _round_up(tb // 2, 16))

    # Auto-shrink tb to fit ~80% of physical VMEM (only when tb is auto).
    if auto_tb:
        while (tb > 64 and
               _vmem_estimate(tb, d_vit, tsae, x.dtype.itemsize, w_dt.itemsize,
                              xhat_dt.itemsize, fx_dt.itemsize, use_scratch)
               > int(0.8 * vmem_cap)):
            tb = max(16, _round_up(tb // 2, 16))

    pb = _round_up(batch, tb)
    psae = _round_up(d_sae, tsae)

    # Zero-padding is exact: padded encoder rows give f_x == 0 and padded
    # (zero) W_dec rows contribute nothing to x_hat.
    if pb != batch:
        x = jnp.pad(x, ((0, pb - batch), (0, 0)))
    if psae != d_sae:
        w_enc_t = jnp.pad(w_enc_t, ((0, psae - d_sae), (0, 0)))
        w_dec_c = jnp.pad(w_dec_c, ((0, psae - d_sae), (0, 0)))
        b_enc_eff = jnp.pad(b_enc_eff, ((0, 0), (0, psae - d_sae)))

    grid = (pb // tb, psae // tsae)
    n_btiles = pb // tb

    # Honest advisory cost estimate: weights are re-read once per batch tile.
    flops = 4 * batch * d_vit * d_sae
    bytes_accessed = (
        pb * d_vit * x.dtype.itemsize
        + n_btiles * 2 * psae * d_vit * w_dt.itemsize   # W_enc^T + W_dec streams
        + pb * d_vit * xhat_dt.itemsize                 # x_hat write
        + pb * psae * fx_dt.itemsize                    # f_x write
        + psae * 4 + d_vit * 4)                         # biases

    est = _vmem_estimate(tb, d_vit, tsae, x.dtype.itemsize, w_dt.itemsize,
                         xhat_dt.itemsize, fx_dt.itemsize, use_scratch)
    vmem_limit = int(min(max(vmem_cap - (8 << 20), 16 << 20),
                         max(32 << 20, est + (4 << 20))))

    kernel = sae_fwd_kernel_scratch if use_scratch else sae_fwd_kernel_direct
    scratch_shapes = ([pltpu.VMEM((tb, d_vit), jnp.float32)]
                      if use_scratch else [])

    x_hat, f_x = pl.pallas_call(
        kernel,
        out_shape=(
            jax.ShapeDtypeStruct((pb, d_vit), xhat_dt),   # x_hat
            jax.ShapeDtypeStruct((pb, psae), fx_dt),      # f_x
        ),
        grid_spec=pltpu.PrefetchScalarGridSpec(
            num_scalar_prefetch=0,
            grid=grid,
            in_specs=[
                pl.BlockSpec((tb, d_vit), lambda i, k: (i, 0)),     # x (resident over k)
                pl.BlockSpec((tsae, d_vit), lambda i, k: (k, 0)),   # W_enc^T row block
                pl.BlockSpec((1, tsae), lambda i, k: (0, k)),       # folded encoder bias
                pl.BlockSpec((tsae, d_vit), lambda i, k: (k, 0)),   # W_dec row block
                pl.BlockSpec((1, d_vit), lambda i, k: (0, 0)),      # decoder bias
            ],
            out_specs=[
                pl.BlockSpec((tb, d_vit), lambda i, k: (i, 0)),     # x_hat (accumulated)
                pl.BlockSpec((tb, tsae), lambda i, k: (i, k)),      # f_x
            ],
            scratch_shapes=scratch_shapes,
        ),
        compiler_params=pltpu.CompilerParams(
            dimension_semantics=("parallel", "arbitrary"),
            vmem_limit_bytes=vmem_limit,
        ),
        cost_estimate=pl.CostEstimate(
            flops=int(flops), transcendentals=0,
            bytes_accessed=int(bytes_accessed)),
    )(x, w_enc_t, b_enc_eff, w_dec_c, b_dec2)

    return x_hat[:batch], f_x[:batch, :d_sae]


# ----------------------------------------------------------------------------
# Reference + test harness
# ----------------------------------------------------------------------------
def kaiming_uniform(key, shape):
    """torch.nn.init.kaiming_uniform_ defaults: a=0, gain=sqrt(2), fan_in=shape[1]."""
    fan_in = shape[1]
    bound = math.sqrt(6.0 / fan_in)
    return jax.random.uniform(key, shape, jnp.float32, minval=-bound, maxval=bound)


def sae_forward_ref(x, w_enc, b_enc, w_dec, b_dec):
    """Pure-JAX reference mirroring the torch forward."""
    h_pre = (x - b_dec) @ w_enc + b_enc
    f_x = jnp.maximum(h_pre, 0.0)
    x_hat = f_x @ w_dec + b_dec
    return x_hat, f_x


if __name__ == "__main__":
    key = jax.random.PRNGKey(0)
    k_x, k_enc, k_be, k_dec, k_bd, k_x2 = jax.random.split(key, 6)

    batch, d_vit, d_sae = 32, 128, 384
    x = jax.random.normal(k_x, (batch, d_vit), jnp.float32)
    W_enc = kaiming_uniform(k_enc, (d_vit, d_sae))
    b_enc = 0.01 * jax.random.normal(k_be, (d_sae,), jnp.float32)
    W_dec = kaiming_uniform(k_dec, (d_sae, d_vit))
    b_dec = 0.1 * jax.random.normal(k_bd, (d_vit,), jnp.float32)

    x_hat_ref, f_x_ref = sae_forward_ref(x, W_enc, b_enc, W_dec, b_dec)

    # ---- Case 1: f32 weights, small tiles -> multi-step accumulation -------
    x_hat, f_x = jax.block_until_ready(
        sae_forward(x, W_enc, b_enc, W_dec, b_dec,
                    tb=16, tsae=128, weight_dtype=None))
    assert x_hat.shape == (batch, d_vit) and f_x.shape == (batch, d_sae)
    assert jnp.allclose(x_hat, x_hat_ref, atol=5e-2, rtol=5e-2)
    assert jnp.allclose(f_x, f_x_ref, atol=5e-2, rtol=5e-2)

    # ---- Case 2: defaults (auto tb, bf16 weights + bf16 MXU operands) ------
    x_hat2, f_x2 = jax.block_until_ready(sae_forward(x, W_enc, b_enc, W_dec, b_dec))
    assert x_hat2.shape == (batch, d_vit) and f_x2.shape == (batch, d_sae)
    assert jnp.allclose(x_hat2, x_hat_ref, atol=1e-1, rtol=1e-1)
    assert jnp.allclose(f_x2, f_x_ref, atol=1e-1, rtol=1e-1)

    # ---- Case 3: ragged batch, bf16 f_x output, streamed d_sae --------------
    batch3 = 20
    x3 = jax.random.normal(k_x2, (batch3, d_vit), jnp.float32)
    x_hat3_ref, f_x3_ref = sae_forward_ref(x3, W_enc, b_enc, W_dec, b_dec)
    x_hat3, f_x3 = jax.block_until_ready(
        sae_forward(x3, W_enc, b_enc, W_dec, b_dec,
                    tb=16, tsae=256, weight_dtype=jnp.bfloat16,
                    fx_dtype=jnp.bfloat16))
    assert x_hat3.shape == (batch3, d_vit) and f_x3.shape == (batch3, d_sae)
    assert f_x3.dtype == jnp.bfloat16
    assert jnp.allclose(x_hat3, x_hat3_ref, atol=1e-1, rtol=1e-1)
    assert jnp.allclose(f_x3.astype(jnp.float32), f_x3_ref, atol=1e-1, rtol=1e-1)

    print("KERNEL_OK")
</pallas_src>

<mosaic_0001>
module attributes {stable_mosaic.version = 11 : i64} {
  func.func @sae_fwd_kernel_direct(%arg0: i32, %arg1: i32, %arg2: memref<16x128xf32, #tpu.memory_space<vmem>>, %arg3: memref<128x128xf32, #tpu.memory_space<vmem>>, %arg4: memref<1x128xf32, #tpu.memory_space<vmem>>, %arg5: memref<128x128xf32, #tpu.memory_space<vmem>>, %arg6: memref<1x128xf32, #tpu.memory_space<vmem>>, %arg7: memref<16x128xf32, #tpu.memory_space<vmem>>, %arg8: memref<16x128xf32, #tpu.memory_space<vmem>>) attributes {dimension_semantics = [#tpu.dimension_semantics<parallel>, #tpu.dimension_semantics<arbitrary>], iteration_bounds = array<i64: 2, 3>, scalar_prefetch = 0 : i64, scratch_operands = 0 : i64, tpu.core_type = #tpu.core_type<tc>, window_params = [{transform_indices = @transform_0, window_bounds = array<i64: 16, 128>}, {transform_indices = @transform_1, window_bounds = array<i64: 128, 128>}, {transform_indices = @transform_2, window_bounds = array<i64: 1, 128>}, {transform_indices = @transform_3, window_bounds = array<i64: 128, 128>}, {pipeline_mode = #tpu.pipeline_mode<synchronous>, transform_indices = @transform_4, window_bounds = array<i64: 1, 128>}, {transform_indices = @transform_5, window_bounds = array<i64: 16, 128>}, {transform_indices = @transform_6, window_bounds = array<i64: 16, 128>}]} {
    %c0_i32 = arith.constant 0 : i32
    %0 = arith.cmpi eq, %arg1, %c0_i32 : i32
    %1 = arith.extui %0 : i1 to i32
    %c0_i32_0 = arith.constant 0 : i32
    %2 = arith.cmpi ne, %1, %c0_i32_0 : i32
    scf.if %2 {
      %cst_17 = arith.constant 0.000000e+00 : f32
      %20 = vector.broadcast %cst_17 : f32 to vector<16x128xf32>
      %c0_18 = arith.constant 0 : index
      %c0_19 = arith.constant 0 : index
      %21 = vector.load %arg7[%c0_18, %c0_19] : memref<16x128xf32, #tpu.memory_space<vmem>>, vector<16x128xf32>
      tpu.vector_store %arg7[%c0_18, %c0_19], %20 {strides = array<i32>} : memref<16x128xf32, #tpu.memory_space<vmem>>, vector<16x128xf32>,
    } else {
    }
    %c0 = arith.constant 0 : index
    %c0_1 = arith.constant 0 : index
    %3 = vector.load %arg7[%c0, %c0_1] : memref<16x128xf32, #tpu.memory_space<vmem>>, vector<16x128xf32>
    %c0_2 = arith.constant 0 : index
    %c0_3 = arith.constant 0 : index
    %4 = vector.load %arg2[%c0_2, %c0_3] : memref<16x128xf32, #tpu.memory_space<vmem>>, vector<16x128xf32>
    %c0_4 = arith.constant 0 : index
    %c0_5 = arith.constant 0 : index
    %5 = vector.load %arg3[%c0_4, %c0_5] : memref<128x128xf32, #tpu.memory_space<vmem>>, vector<128x128xf32>
    %cst = arith.constant dense<0.000000e+00> : vector<16x128xf32>
    %6 = tpu.matmul %4, %5, %cst {dimension_numbers = #tpu.dot_dimension_numbers<[1], [1], [0], [0], [0, 0, 1, 0], [], []>} : vector<16x128xf32>, vector<128x128xf32>, vector<16x128xf32> -> vector<16x128xf32>
    %c0_6 = arith.constant 0 : index
    %c0_7 = arith.constant 0 : index
    %7 = vector.load %arg4[%c0_6, %c0_7] : memref<1x128xf32, #tpu.memory_space<vmem>>, vector<1x128xf32>
    %8 = vector.broadcast %7 : vector<1x128xf32> to vector<16x128xf32>
    %9 = arith.addf %6, %8 : vector<16x128xf32>
    %cst_8 = arith.constant 0.000000e+00 : f32
    %10 = vector.broadcast %cst_8 : f32 to vector<16x128xf32>
    %11 = arith.maximumf %9, %10 : vector<16x128xf32>
    %c0_9 = arith.constant 0 : index
    %c0_10 = arith.constant 0 : index
    %12 = vector.load %arg8[%c0_9, %c0_10] : memref<16x128xf32, #tpu.memory_space<vmem>>, vector<16x128xf32>
    tpu.vector_store %arg8[%c0_9, %c0_10], %11 {strides = array<i32>} : memref<16x128xf32, #tpu.memory_space<vmem>>, vector<16x128xf32>,
    %c0_11 = arith.constant 0 : index
    %c0_12 = arith.constant 0 : index
    %13 = vector.load %arg5[%c0_11, %c0_12] : memref<128x128xf32, #tpu.memory_space<vmem>>, vector<128x128xf32>
    %cst_13 = arith.constant dense<0.000000e+00> : vector<16x128xf32>
    %14 = tpu.matmul %11, %13, %cst_13 {dimension_numbers = #tpu.dot_dimension_numbers<[1], [0], [0], [1], [0, 0, 1, 1], [], []>} : vector<16x128xf32>, vector<128x128xf32>, vector<16x128xf32> -> vector<16x128xf32>
    %15 = arith.addf %3, %14 : vector<16x128xf32>
    %c0_14 = arith.constant 0 : index
    %c0_15 = arith.constant 0 : index
    %16 = vector.load %arg7[%c0_14, %c0_15] : memref<16x128xf32, #tpu.memory_space<vmem>>, vector<16x128xf32>
    tpu.vector_store %arg7[%c0_14, %c0_15], %15 {strides = array<i32>} : memref<16x128xf32, #tpu.memory_space<vmem>>, vector<16x128xf32>,
    %c2_i32 = arith.constant 2 : i32
    %17 = arith.cmpi eq, %arg1, %c2_i32 : i32
    %18 = arith.extui %17 : i1 to i32
    %c0_i32_16 = arith.constant 0 : i32
    %19 = arith.cmpi ne, %18, %c0_i32_16 : i32
    scf.if %19 {
      %c0_17 = arith.constant 0 : index
      %c0_18 = arith.constant 0 : index
      %20 = vector.load %arg7[%c0_17, %c0_18] : memref<16x128xf32, #tpu.memory_space<vmem>>, vector<16x128xf32>
      %c0_19 = arith.constant 0 : index
      %c0_20 = arith.constant 0 : index
      %21 = vector.load %arg6[%c0_19, %c0_20] : memref<1x128xf32, #tpu.memory_space<vmem>>, vector<1x128xf32>
      %22 = vector.broadcast %21 : vector<1x128xf32> to vector<16x128xf32>
      %23 = arith.addf %20, %22 : vector<16x128xf32>
      %c0_21 = arith.constant 0 : index
      %c0_22 = arith.constant 0 : index
      %24 = vector.load %arg7[%c0_21, %c0_22] : memref<16x128xf32, #tpu.memory_space<vmem>>, vector<16x128xf32>
      tpu.vector_store %arg7[%c0_21, %c0_22], %23 {strides = array<i32>} : memref<16x128xf32, #tpu.memory_space<vmem>>, vector<16x128xf32>,
    } else {
    }
    return
  }
  func.func @transform_0(%arg0: i32, %arg1: i32) -> (i32, i32) {
    %c0_i32 = arith.constant 0 : i32
    %c0_i32_0 = arith.constant 0 : i32
    return %arg0, %c0_i32 : i32, i32
  }
  func.func @transform_1(%arg0: i32, %arg1: i32) -> (i32, i32) {
    %c0_i32 = arith.constant 0 : i32
    %c0_i32_0 = arith.constant 0 : i32
    return %arg1, %c0_i32 : i32, i32
  }
  func.func @transform_2(%arg0: i32, %arg1: i32) -> (i32, i32) {
    %c0_i32 = arith.constant 0 : i32
    %c0_i32_0 = arith.constant 0 : i32
    return %c0_i32, %arg1 : i32, i32
  }
  func.func @transform_3(%arg0: i32, %arg1: i32) -> (i32, i32) {
    %c0_i32 = arith.constant 0 : i32
    %c0_i32_0 = arith.constant 0 : i32
    return %arg1, %c0_i32 : i32, i32
  }
  func.func @transform_4(%arg0: i32, %arg1: i32) -> (i32, i32) {
    %c0_i32 = arith.constant 0 : i32
    %c0_i32_0 = arith.constant 0 : i32
    %c0_i32_1 = arith.constant 0 : i32
    return %c0_i32, %c0_i32_0 : i32, i32
  }
  func.func @transform_5(%arg0: i32, %arg1: i32) -> (i32, i32) {
    %c0_i32 = arith.constant 0 : i32
    %c0_i32_0 = arith.constant 0 : i32
    return %arg0, %c0_i32 : i32, i32
  }
  func.func @transform_6(%arg0: i32, %arg1: i32) -> (i32, i32) {
    %c0_i32 = arith.constant 0 : i32
    return %arg0, %arg1 : i32, i32
  }
}

</mosaic_0001>

<bundles_post_ra>
// kernel: tpu_custom_call.1
= control target key start
LH: loop header
LB: loop body
LE: loop exit
PB: predicated region body
PF: predicated region fallthrough
CT: control target
= control target key end

     0   :  { %s1737_s0 = inlined_call_operand.hbm [shape: f32[32,128], index: 0, kind: input, shape index: {}]   ;;  %s1738_s1 = inlined_call_operand.hbm [shape: f32[384,128], index: 1, kind: input, shape index: {}]   ;;  %s1739_s2 = inlined_call_operand.hbm [shape: f32[1,384], index: 2, kind: input, shape index: {}]   ;;  %s1740_s3 = inlined_call_operand.hbm [shape: f32[384,128], index: 3, kind: input, shape index: {}]   ;;  %s1741_s4 = inlined_call_operand.vmem [shape: f32[1,128], index: 4, kind: input, shape index: {}]   ;;  %s1742_s5 = inlined_call_operand.hbm [shape: f32[32,128], index: 5, kind: output, shape index: {0}]   ;;  %s1743_s6 = inlined_call_operand.hbm [shape: f32[32,384], index: 6, kind: output, shape index: {1}]  }
   0x1   :  { %1766 = sst [smem:[#allocation34_spill]] %s1737_s0 }
   0x2   :  { %1767 = sst [smem:[#allocation35_spill]] %s1738_s1 }
   0x3   :  { %1768 = sst [smem:[#allocation36_spill]] %s1739_s2 }
   0x4   :  { %1769 = sst [smem:[#allocation37_spill]] %s1741_s4 }
   0x5   :  { %1770 = sst [smem:[#allocation38_spill]] %s1742_s5 }
   0x6   :  { %1771 = sst [smem:[#allocation39_spill]] %s1743_s6 }
   0x7   :  { %12 = vsyncpa [#allocation3], 0 }
   0x8   :  { %14 = vsyncpa [#allocation3 + $0x1], 0 }
   0x9   :  { %15 = vsyncpa [#allocation6], 0 }
   0xa   :  { %17 = vsyncpa [#allocation6 + $0x1], 0 }
   0xb   :  { %18 = vsyncpa [#allocation9], 0 }
   0xc   :  { %20 = vsyncpa [#allocation9 + $0x1], 0 }
   0xd   :  { %21 = vsyncpa [#allocation4], 0 }
   0xe   :  { %23 = vsyncpa [#allocation4 + $0x1], 0 }
   0xf   :  { %24 = vsyncpa [#allocation12], 0 }
  0x10   :  { %26 = vsyncpa [#allocation12 + $0x1], 0  ;;  %s1307_s21 = smov 0   ;;  %s1309_s22 = smov 0  }
  0x11   :  { %s1311_s23 = smov 0   ;;  %s1313_s24 = smov 0  }
  0x12   :  { %s1315_s25 = smov 0   ;;  %s1317_s26 = smov 0  }
  0x13   :  { %s1319_s27 = smov 0   ;;  %s1321_s28 = smov 0  }
  0x14   :  { %s1323_s29 = smov 0   ;;  %s1325_s30 = smov 0  }
  0x15   :  { %s1327_s7 = smov 0   ;;  %s1329_s8 = smov 0  }
  0x16   :  { %s1331_s9 = smov 0   ;;  %s1333_s10 = smov 0  }
  0x17 LB: > { %1772 = sst [smem:[#allocation18_spill]] %s1212_s21  ;;  %s41_s11 = sadd.s32 1, %s1256_s8  ;;  %s1264_s10 = sphi %s1333_s10, %s32_s10   ;;  %s1260_s9 = sphi %s1331_s9, %s1830_s9   ;;  %s1256_s8 = sphi %s1329_s8, %s1840_s8   ;;  %s1252_s7 = sphi %s1327_s7, %s1828_s7   ;;  %s1248_s30 = sphi %s1325_s30, %s1839_s30   ;;  %s1244_s29 = sphi %s1323_s29, %s1838_s29   ;;  %s1240_s28 = sphi %s1321_s28, %s1837_s28   ;;  %s1236_s27 = sphi %s1319_s27, %s1836_s27   ;;  %s1232_s26 = sphi %s1317_s26, %s1825_s26   ;;  %s1228_s25 = sphi %s1315_s25, %s1835_s25   ;;  %s1224_s24 = sphi %s1313_s24, %s1834_s24   ;;  %s1220_s23 = sphi %s1311_s23, %s1823_s23   ;;  %s1216_s22 = sphi %s1309_s22, %s1833_s22   ;;  %s1212_s21 = sphi %s1307_s21, %s1832_s21  }
  0x18   : > { %1773 = sst [smem:[#allocation19_spill]] %s1220_s23  ;;  %p59_p0 = scmp.eq.s32.totalorder %s1264_s10, 0 }
  0x19   : > { %1774 = sst [smem:[#allocation20_spill]] %s1232_s26  ;;  %p1379_p1 = scmp.ge.s32.totalorder %s41_s11, 3 }
  0x1a   : > { %1775 = sst [smem:[#allocation21_spill]] %s1236_s27  ;;  %s77_s13 = sadd.s32 1, %s1232_s26 }
  0x1b   : > { %1776 = sst [smem:[#allocation22_spill]] %s1244_s29  ;;  %p84_p2 = scmp.ne.s32.totalorder %s1232_s26, %s1228_s25 }
  0x1c   : > { %1777 = sst [smem:[#allocation23_spill]] %s1248_s30  ;;  %p90_p3 = scmp.ne.s32.totalorder %s1228_s25, %s1224_s24 }
  0x1d   : > { %1778 = sst [smem:[#allocation24_spill]] %s1252_s7  ;;  %s1842_s11 = smov (%p1379_p1, %s41_s11), 0 }
  0x1e   : > { %1779 = sst [smem:[#allocation25_spill]] %s1260_s9  ;;  %p1394_p4 = por %p84_p2, %p59_p0 }
  0x1f   : > { %1781 = sst [smem:[#allocation26_spill]] %s1842_s11  ;;  %s1400_s15 = ssub.s32 %s1256_s8, %s1842_s11 }
  0x20   : > { %p1755_p5 = scmp.lt.s32.totalorder %s1264_s10, 6  ;;  %p75_p6 = scmp.eq.s32.totalorder %s1400_s15, 0 }
  0x21   : > { %s266_s16 = sand.u32 1, %s1264_s10   ;;  %s1409_s18 = sand.u32 1, %s1232_s26  }
  0x22   : > { %s1406_s17 = scalar_select %p75_p6, %s1232_s26, %s77_s13  }
  0x23   : > { %s1748_s19 = sshll.u32 %s1409_s18, 7  ;;  %s1749_s20 = sshll.u32 %s1256_s8, 7 }
  0x24   : > { %1783 = sst [smem:[#allocation27_spill]] %s1406_s17  ;;  %s270_s13 = scalar_lea.vmem [#allocation5], %s1748_s19 }
  0x25   : > { %s1784_s1 = sld [smem:[#allocation35_spill]]  ;;  %s278_s17 = sshll.u32 %s270_s13, 4  ;;  %s279_s17 = int_to_ptr.vmem [resolvable:$true] %s278_s17 }
  0x26   : > { %p1424_p7 = pnand %p1755_p5, %p1394_p4  ;;  %p766_p8 = scmp.ge.s32.totalorder %s1264_s10, 1 }
  0x27   : > { %p325_p9 = scmp.lt.s32.totalorder %s1264_s10, 7  ;;  %s1430_s6 = scalar_lea.sflag [#allocation6], %s266_s16 }
  0x28   : > { %s1752_s14 = smov 8   ;;  %s1443_s19 = sadd.s32 4294967295, %s1264_s10  }
  0x29   : > { %p1438_p10 = pnand %p766_p8, %p325_p9  ;;  %s754_s16 = sadd.s32 4294967294, %s1264_s10  }
  0x2a   : > { %p58_p11 = scmp.ne.s32.totalorder %s1244_s29, %s1240_s28  ;;  %p64_p13 = scmp.ne.s32.totalorder %s1240_s28, %s1236_s27 }
  0x2b   : > { %s275_s11 = scalar_lea.hbm %s1784_s1, %s1749_s20  ;;  %s44_s20 = sadd.s32 1, %s1260_s9 }
  0x2c   : > { %s276_s7 = sshll.u32 %s275_s11, 4  ;;  %s1750_s11 = smov 128   ;;  %s277_s7 = int_to_ptr.hbm [resolvable:$true] %s276_s7 }
  0x2d   : > { %822 = dma.hbm_to_vmem [thread:$0]  (!%p1424_p7), %s277_s7, 2048, %s279_s17, %s1430_s6, %s1750_s11, %s1750_s11, %s1752_s14  }
  0x2e   : > { %s1844_s20 = smov (!%p1379_p1, %s44_s20), %s1260_s9  ;;  %s51_s1 = sadd.s32 1, %s1244_s29 }
  0x2f   : > { %p46_p12 = scmp.ge.s32.totalorder %s1844_s20, 2  ;;  %p1457_p2 = por %p59_p0, %p58_p11 }
  0x30   : > { %p65_p4 = scmp.eq.s32.totalorder %s1443_s19, 0  ;;  %p187_p0 = scmp.eq.s32.totalorder %s1443_s19, 5 }
  0x31   : > { %s1846_s20 = smov (%p46_p12, %s1844_s20), 0  ;;  %p1481_p9 = scmp.eq.s32.totalorder %s754_s16, 5 }
  0x32   : > { %1788 = sst [smem:[#allocation28_spill]] %s1846_s20  ;;  %p1467_p1 = por %p65_p4, %p64_p13 }
  0x33   : > { %p1474_p6 = por %p90_p3, %p65_p4  ;;  %s48_s11 = ssub.s32 %s1260_s9, %s1846_s20 }
  0x34   : > { %p49_p8 = scmp.eq.s32.totalorder %s48_s11, 0  ;;  %p1485_p12 = por %p187_p0, %p58_p11 }
  0x35   : > { %s1790_s17 = scalar_select %p1474_p6, 1, 0 }
  0x36   : > { %s201_s24 = sor.u32 %s1400_s15, %s48_s11  ;;  %p1498_p3 = por %p1481_p9, %p64_p13 }
  0x37   : > { %1791 = sst [smem:[#allocation29_spill]] %s1790_s17  ;;  %p202_p4 = scmp.eq.s32.totalorder %s201_s24, 0 }
  0x38   : > { %s1491_s4 = scalar_select %p49_p8, %s1244_s29, %s51_s1  }
  0x39   : > { %s1795_s30 = scalar_select %p1498_p3, 1, 0 }
  0x3a   : > { %1794 = sst [smem:[#allocation30_spill]] %s1491_s4  ;;  %s204_s16 = sadd.s32 1, %s1220_s23 }
  0x3b   : > { %1796 = sst [smem:[#allocation31_spill]] %s1795_s30  ;;  %p214_p5 = scmp.ne.s32.totalorder %s1220_s23, %s1216_s22 }
  0x3c   : > { %s1506_s20 = scalar_select %p202_p4, %s1220_s23, %s204_s16  }
  0x3d   : > { %p1508_p11 = por %p214_p5, %p187_p0  ;;  %p220_p8 = scmp.ne.s32.totalorder %s1216_s22, %s1212_s21 }
  0x3e   : > { %1797 = sst [smem:[#allocation32_spill]] %s1506_s20  ;;  %s244_s1 = sand.u32 1, %s1244_s29  }
  0x3f   : > { %s783_s15 = sshll.u32 %s1260_s9, 4  ;;  %p1518_p13 = por %p220_p8, %p1481_p9 }
  0x40   : > { %s757_s24 = sshll.u32 %s244_s1, 4  ;;  %s1801_s0 = sld [smem:[#allocation34_spill]] }
  0x41   : > { %s1799_s11 = scalar_select %p1518_p13, 1, 0 }
  0x42   : > { %s248_s23 = scalar_lea.vmem [#allocation2], %s757_s24  ;;  %p1802_p5 = scmp.lt.s32.totalorder %s1264_s10, 6 }
  0x43   : > { %1800 = sst [smem:[#allocation33_spill]] %s1799_s11  ;;  %s256_s29 = sshll.u32 %s248_s23, 4  ;;  %s257_s29 = int_to_ptr.vmem [resolvable:$true] %s256_s29 }
  0x44   : > { %p817_p0 = pnand %p1802_p5, %p1457_p2  ;;  %s1803_s2 = sld [smem:[#allocation36_spill]] }
  0x45   : > { %s245_s30 = scalar_lea.sflag [#allocation3], %s244_s1  ;;  %s1804_s21 = smov 8  }
  0x46   : > { %s253_s16 = scalar_lea.hbm %s1801_s0, %s783_s15  ;;  %s1805_s15 = smov 128  }
  0x47   : > { %s254_s20 = sshll.u32 %s253_s16, 4  ;;  %s291_s16 = scalar_lea.vmem [#allocation7], %s1409_s18  ;;  %s255_s20 = int_to_ptr.hbm [resolvable:$true] %s254_s20 }
  0x48   : > { %819 = dma.hbm_to_vmem [thread:$0]  (!%p817_p0), %s255_s20, 256, %s257_s29, %s245_s30, %s1805_s15, %s1805_s15, %s1804_s21  }
  0x49   : > { %s298_s24 = sshll.u32 %s291_s16, 4  ;;  %s1806_s23 = sshll.u32 %s1256_s8, 7  ;;  %s299_s24 = int_to_ptr.vmem [resolvable:$true] %s298_s24 }
  0x4a   : > { %s294_s11 = scalar_lea.hbm %s1803_s2, %s1256_s8  ;;  %s314_s9 = scalar_lea.hbm %s1740_s3, %s1806_s23 }
  0x4b   : > { %s296_s4 = sshll.u32 %s294_s11, 4  ;;  %s315_s14 = sshll.u32 %s314_s9, 4  ;;  %s297_s4 = int_to_ptr.hbm [resolvable:$true] %s296_s4  ;;  %s316_s14 = int_to_ptr.hbm [resolvable:$true] %s315_s14 }
  0x4c   : > { %825 = dma.hbm_to_vmem [thread:$0]  (!%p1424_p7), %s297_s4, 16, %s299_s24, %s1430_s6  }
  0x4d   : > { %s1807_s2 = sshll.u32 %s1409_s18, 7  ;;  %s306_s1 = scalar_lea.sflag [#allocation9], %s1409_s18 }
  0x4e   : > { %s309_s27 = scalar_lea.vmem [#allocation8], %s1807_s2  ;;  %329 = sbr.rel (%p1438_p10) target bundleno = 493 (0x1ed), region = 40 }
  0x4f   : > { %s317_s11 = sshll.u32 %s309_s27, 4  ;;  %s1556_s29 = sand.u32 (!%p1438_p10), 1, %s1240_s28   ;;  %s318_s11 = int_to_ptr.vmem [resolvable:$true] %s317_s11 }
  0x50   : > { %828 = dma.hbm_to_vmem [thread:$0]  (!%p1424_p7), %s316_s14, 2048, %s318_s11, %s306_s1, %s1805_s15, %s1805_s15, %s1804_s21  }
  0x51   : > { %s767_s0 = sshll.u32 (!%p1438_p10), %s1556_s29, 4  ;;  %s332_s2 = scalar_lea.sflag (!%p1438_p10), [#allocation3], %s1556_s29 }
  0x52   : > { %s1560_s27 = scalar_lea.vmem (!%p1438_p10), [#allocation2], %s767_s0 }
  0x53   : > { %1191 = dma.done.wait (%p1467_p1), %s332_s2, 256  }
  0x54   : > { %1193 = vsyncadd (%p1467_p1), %s332_s2, 4294967040  ;;  %s341_s18 = sand.u32 1, %s1443_s19   ;;  %s1568_s20 = sand.u32 1, %s1228_s25  }
  0x55   : > { %s768_s5 = sshll.u32 %s1568_s20, 7  ;;  %s342_s6 = scalar_lea.sflag [#allocation6], %s341_s18 }
  0x56   : > { %s1571_s13 = scalar_lea.vmem [#allocation5], %s768_s5 }
  0x57   : > { %1195 = dma.done.wait (%p1474_p6), %s342_s6, 2064  }
  0x58   : > { %1197 = vsyncadd (%p1474_p6), %s342_s6, 4294965232  ;;  %s354_s12 = scalar_lea.vmem [#allocation7], %s1568_s20  ;;  %s361_s4 = scalar_lea.sflag [#allocation9], %s1568_s20 }
  0x59   : > { %s1579_s30 = scalar_lea.vmem [#allocation8], %s768_s5 }
  0x5a   : > { %1199 = dma.done.wait (%p1474_p6), %s361_s4, 2048  }
  0x5b   : > { %1201 = vsyncadd (%p1474_p6), %s361_s4, 4294965248  ;;  %s410_s19 = sand.u32 1, %s1216_s22   ;;  %s1588_s16 = scalar_lea.vmem [#allocation10], %s767_s0 }
  0x5c   : > { %s771_s15 = sshll.u32 %s410_s19, 4  ;;  %s1809_s23 = sld [smem:[#allocation23_spill]] }
  0x5d   : > { %s1590_s24 = scalar_lea.vmem [#allocation11], %s771_s15 }
  0x62   : > { %p772_p7 = scmp.ne.s32.totalorder %s1809_s23, 0 }
  0x64   : > { %421 = sbr.rel (%p772_p7) target bundleno = 108 (0x6c), region = 60 }
  0x69   : > { %v1268_v0 = vmov 0.0  }
  0x6a   : > { %422 = vst [vmem:[%s1588_s16] sm:$0xff] %v1268_v0 }
  0x6b   : > { %423 = vst [vmem:[%s1588_s16 + $0x8] sm:$0xff] %v1268_v0 }
  0x6c PF: > { %v443_v1 = vld [vmem:[%s1571_s13 + $0x78] sm:$0xff]  ;;  %v442_v2 = vld [vmem:[%s1571_s13 + $0x70] sm:$0xff]  ;;  %v441_v3 = vld [vmem:[%s1571_s13 + $0x68] sm:$0xff]  ;;  %s1810_s7 = sld [smem:[#allocation23_spill]] }
  0x6d   : > { %448 = vmatpush.xpose.msra.mxu0 %v443_v1  ;;  %787 = vmatpush.xpose.msra.mxu2 %v443_v1  ;;  %v440_v4 = vld [vmem:[%s1571_s13 + $0x60] sm:$0xff]  ;;  %v439_v5 = vld [vmem:[%s1571_s13 + $0x58] sm:$0xff]  ;;  %v438_v6 = vld [vmem:[%s1571_s13 + $0x50] sm:$0xff] }
  0x6e   : > { %v437_v7 = vld [vmem:[%s1571_s13 + $0x48] sm:$0xff]  ;;  %v436_v8 = vld [vmem:[%s1571_s13 + $0x40] sm:$0xff]  ;;  %v435_v9 = vld [vmem:[%s1571_s13 + $0x38] sm:$0xff] }
  0x6f   : > { %v490_v10 = vld [vmem:[%s1579_s30 + $0x78] sm:$0xff]  ;;  %v489_v11 = vld [vmem:[%s1579_s30 + $0x70] sm:$0xff]  ;;  %v488_v13 = vld [vmem:[%s1579_s30 + $0x68] sm:$0xff] }
  0x70   : > { %v434_v12 = vld [vmem:[%s1571_s13 + $0x30] sm:$0xff]  ;;  %491 = vmatpush.msra.mxu1 %v490_v10  ;;  %v487_v14 = vld [vmem:[%s1579_s30 + $0x60] sm:$0xff]  ;;  %v486_v16 = vld [vmem:[%s1579_s30 + $0x58] sm:$0xff] }
  0x71   : > { %449 = vmatpush.xpose.msra.mxu0 %v442_v2  ;;  %788 = vmatpush.xpose.msra.mxu2 %v442_v2  ;;  %v433_v15 = vld [vmem:[%s1571_s13 + $0x28] sm:$0xff]  ;;  %v485_v17 = vld [vmem:[%s1579_s30 + $0x50] sm:$0xff]  ;;  %v432_v18 = vld [vmem:[%s1571_s13 + $0x20] sm:$0xff] }
  0x72   : > { %492 = vmatpush.msra.mxu1 %v489_v11  ;;  %v484_v19 = vld [vmem:[%s1579_s30 + $0x48] sm:$0xff]  ;;  %v483_v20 = vld [vmem:[%s1579_s30 + $0x40] sm:$0xff]  ;;  %v431_v21 = vld [vmem:[%s1571_s13 + $0x18] sm:$0xff]  ;;  %p773_p10 = scmp.ne.s32.totalorder %s1810_s7, 2 }
  0x73   : > { %v482_v22 = vld [vmem:[%s1579_s30 + $0x38] sm:$0xff]  ;;  %v481_v23 = vld [vmem:[%s1579_s30 + $0x30] sm:$0xff]  ;;  %v480_v25 = vld [vmem:[%s1579_s30 + $0x28] sm:$0xff]  ;;  %s1811_s11 = sld [smem:[#allocation37_spill]] (!%p773_p10) }
  0x74   : > { %493 = vmatpush.msra.mxu1 %v488_v13  ;;  %v430_v24 = vld [vmem:[%s1571_s13 + $0x10] sm:$0xff]  ;;  %v479_v26 = vld [vmem:[%s1579_s30 + $0x20] sm:$0xff]  ;;  %v478_v28 = vld [vmem:[%s1579_s30 + $0x18] sm:$0xff] }
  0x75   : > { %450 = vmatpush.xpose.msra.mxu0 %v441_v3  ;;  %789 = vmatpush.xpose.msra.mxu2 %v441_v3  ;;  %v429_v27 = vld [vmem:[%s1571_s13 + $0x8] sm:$0xff]  ;;  %v428_v29 = vld [vmem:[%s1571_s13] sm:$0xff]  ;;  %v477_v32 = vld [vmem:[%s1579_s30 + $0x10] sm:$0xff] }
  0x76   : > { %494 = vmatpush.msra.mxu1 %v487_v14  ;;  %v426_v30 = vld [vmem:[%s1560_s27] sm:$0xff]  ;;  %v427_v31 = vld [vmem:[%s1560_s27 + $0x8] sm:$0xff] }
  0x77   : > { %v476_v33 = vld [vmem:[%s1579_s30 + $0x8] sm:$0xff]  ;;  %v475_v34 = vld [vmem:[%s1579_s30] sm:$0xff]  ;;  %v956_v35 = vld [vmem:[%s354_s12] ss:$0 sm:$0xff] }
  0x78   : > { %495 = vmatpush.msra.mxu1 %v486_v16  ;;  %v424_v42 = vld [vmem:[%s1588_s16] sm:$0xff]  ;;  %v425_v45 = vld [vmem:[%s1588_s16 + $0x8] sm:$0xff] }
  0x79   : > { %451 = vmatpush.xpose.msra.mxu0 %v440_v4  ;;  %790 = vmatpush.xpose.msra.mxu2 %v440_v4 }
  0x7a   : > { %496 = vmatpush.msra.mxu1 %v485_v17 }
  0x7c   : > { %497 = vmatpush.msra.mxu1 %v484_v19 }
  0x7d   : > { %452 = vmatpush.xpose.msra.mxu0 %v439_v5  ;;  %791 = vmatpush.xpose.msra.mxu2 %v439_v5 }
  0x7e   : > { %498 = vmatpush.msra.mxu1 %v483_v20 }
  0x80   : > { %499 = vmatpush.msra.mxu1 %v482_v22 }
  0x81   : > { %453 = vmatpush.xpose.msra.mxu0 %v438_v6  ;;  %792 = vmatpush.xpose.msra.mxu2 %v438_v6 }
  0x82   : > { %500 = vmatpush.msra.mxu1 %v481_v23 }
  0x84   : > { %501 = vmatpush.msra.mxu1 %v480_v25 }
  0x85   : > { %454 = vmatpush.xpose.msra.mxu0 %v437_v7  ;;  %793 = vmatpush.xpose.msra.mxu2 %v437_v7 }
  0x86   : > { %502 = vmatpush.msra.mxu1 %v479_v26 }
  0x88   : > { %503 = vmatpush.msra.mxu1 %v478_v28 }
  0x89   : > { %455 = vmatpush.xpose.msra.mxu0 %v436_v8  ;;  %794 = vmatpush.xpose.msra.mxu2 %v436_v8 }
  0x8a   : > { %504 = vmatpush.msra.mxu1 %v477_v32 }
  0x8c   : > { %505 = vmatpush.msra.mxu1 %v476_v33 }
  0x8d   : > { %456 = vmatpush.xpose.msra.mxu0 %v435_v9  ;;  %795 = vmatpush.xpose.msra.mxu2 %v435_v9 }
  0x8e   : > { %506 = vmatpush.msra.mxu1 %v475_v34 }
  0x91   : > { %457 = vmatpush.xpose.msra.mxu0 %v434_v12  ;;  %796 = vmatpush.xpose.msra.mxu2 %v434_v12 }
  0x95   : > { %458 = vmatpush.xpose.msra.mxu0 %v433_v15  ;;  %797 = vmatpush.xpose.msra.mxu2 %v433_v15 }
  0x99   : > { %459 = vmatpush.xpose.msra.mxu0 %v432_v18  ;;  %798 = vmatpush.xpose.msra.mxu2 %v432_v18 }
  0x9d   : > { %460 = vmatpush.xpose.msra.mxu0 %v431_v21  ;;  %799 = vmatpush.xpose.msra.mxu2 %v431_v21 }
  0xa1   : > { %461 = vmatpush.xpose.msra.mxu0 %v430_v24  ;;  %800 = vmatpush.xpose.msra.mxu2 %v430_v24 }
  0xa5   : > { %462 = vmatpush.xpose.msra.mxu0 %v429_v27  ;;  %801 = vmatpush.xpose.msra.mxu2 %v429_v27 }
  0xa9   : > { %463 = vmatpush.xpose.msra.mxu0 %v428_v29  ;;  %802 = vmatpush.xpose.msra.mxu2 %v428_v29 }
  0xac   : > { %464 = vmatmul.f32.vlgmr.msra.gmra.mxu0 %v426_v30  ;;  %467 = vmatmul.f32.vlgmr.msra.gmra.mxu2 %v427_v31 }
 0x129   : > { %v465_v36 = vpop.f32.mrf.mxu0 }
 0x12a   : > { %v466_v37 = vadd.f32 %v956_v35, %v465_v36 }
 0x12c   : > { %v471_v38 = vmax.f32 %v466_v37, 0.0 }
 0x12e   : > { %473 = vst [vmem:[%s1590_s24] sm:$0xff] %v471_v38  ;;  %507 = vmatmul.f32.vlgmr.msra.gmra.mxu1 %v471_v38 }
 0x12f   : > { %v468_v39 = vpop.f32.mrf.mxu2 }
 0x130   : > { %v469_v40 = vadd.f32 %v956_v35, %v468_v39 }
 0x132   : > { %v472_v41 = vmax.f32 %v469_v40, 0.0 }
 0x134   : > { %474 = vst [vmem:[%s1590_s24 + $0x8] sm:$0xff] %v472_v41 }
 0x136   : > { %510 = vmatmul.f32.gmra.mxu1 %v472_v41 }
 0x1ab   : > { %v508_v43 = vpop.f32.mrf.mxu1 }
 0x1ac   : > { %v514_v44 = vadd.f32 %v508_v43, %v424_v42 }
 0x1ae   : > { %516 = vst [vmem:[%s1588_s16] sm:$0xff] %v514_v44 }
 0x1b2   : > { %521 = sbr.rel (%p773_p10) target bundleno = 449 (0x1c1), region = 64 }
 0x1b3   : > { %v511_v46 = vpop.f32.mrf.mxu1 }
 0x1b4   : > { %v515_v47 = vadd.f32 %v511_v46, %v425_v45 }
 0x1b6   : > { %517 = vst [vmem:[%s1588_s16 + $0x8] sm:$0xff] %v515_v47 }
 0x1b7   : > { %v522_v48 = vld [vmem:[%s1588_s16] sm:$0xff]  ;;  %v957_v49 = vld [vmem:[%s1811_s11] ss:$0 sm:$0xff] }
 0x1b8   : > { %v528_v51 = vadd.f32 %v957_v49, %v522_v48 }
 0x1ba   : > { %530 = vst [vmem:[%s1588_s16] sm:$0xff] %v528_v51 }
 0x1bd   : > { %v523_v50 = vld [vmem:[%s1588_s16 + $0x8] sm:$0xff] }
 0x1be   : > { %v529_v52 = vadd.f32 %v957_v49, %v523_v50 }
 0x1c0   : > { %531 = vst [vmem:[%s1588_s16 + $0x8] sm:$0xff] %v529_v52 }
 0x1c1 PF: > { %s1812_s1 = sld [smem:[#allocation24_spill]]  ;;  %s550_s5 = sshll.u32 %s1588_s16, 4  ;;  %s551_s5 = int_to_ptr.vmem [resolvable:$true] %s550_s5 }
 0x1c2   : > { %s1813_s21 = sld [smem:[#allocation38_spill]]  ;;  %s533_s13 = scalar_lea.sflag [#allocation4], %s1556_s29 }
 0x1c7   : > { %s786_s0 = sshll.u32 %s1812_s1, 4 }
 0x1c8   : > { %s1814_s18 = smov %s1813_s21  ;;  %s549_s20 = scalar_lea.hbm %s1813_s21, %s786_s0 }
 0x1c9   : > { %s552_s6 = sshll.u32 %s549_s20, 4  ;;  %s1098_s23 = scalar_lea.hbm %s1814_s18, 32  ;;  %s553_s6 = int_to_ptr.hbm [resolvable:$true] %s552_s6 }
 0x1ca   : > { %s1092_s12 = sshra.s32 %s553_s6, 4  ;;  %s1093_s12 = int_to_ptr.hbm [resolvable:$true] %s1092_s12 }
 0x1cb   : > { %s1094_s4 = scalar_lea.hbm %s1093_s12, 16  ;;  %p1099_p9 = scmp.lt.s32.totalorder %s1093_s12, %s1814_s18 }
 0x1cc   : > { %p1095_p2 = scmp.ne.s32.totalorder %s1093_s12, %s1094_s4  ;;  %p1100_p4 = scmp.lt.s32.totalorder %s1098_s23, %s1094_s4 }
 0x1ce   : > { %p1096_p1 = pnand %p1095_p2, %p1485_p12  ;;  %p1101_p8 = por %p1100_p4, %p1099_p9 }
 0x1d0   : > { %p1097_p6 = pneg %p1096_p1 }
 0x1d2   : > { %p1102_p5 = pnand %p1101_p8, %p1097_p6 }
 0x1d4   : > { %1105 = shalt.err (!%p1102_p5)
}
 0x1d5   : > { %s1269_s29 = smov 128   ;;  %s1815_s16 = sld [smem:[#allocation23_spill]] }
 0x1d6   : > { %s1270_s14 = smov 8   ;;  %s803_s11 = smul.u32 6, %s1812_s1 }
 0x1d7   : > { %812 = dma.vmem_to_hbm [thread:$0]  (%p1485_p12), %s551_s5, 256, %s553_s6, %s533_s13, %s1269_s29, %s1269_s29, %s1270_s14  }
 0x1d8   : > { %s569_s0 = sshll.u32 %s1590_s24, 4  ;;  %s1816_s12 = sld [smem:[#allocation39_spill]]  ;;  %s570_s0 = int_to_ptr.vmem [resolvable:$true] %s569_s0 }
 0x1d9   : > { %s538_s15 = scalar_lea.sflag [#allocation12], %s410_s19 }
 0x1db   : > { %s566_s2 = sadd.s32 %s1815_s16, %s803_s11 }
 0x1dc   : > { %s780_s27 = sshll.u32 %s566_s2, 3 }
 0x1de   : > { %s568_s4 = scalar_lea.hbm %s1816_s12, %s780_s27  ;;  %s1126_s1 = scalar_lea.hbm %s1816_s12, 96 }
 0x1df   : > { %s571_s30 = sshll.u32 %s568_s4, 4  ;;  %s572_s30 = int_to_ptr.hbm [resolvable:$true] %s571_s30 }
 0x1e0   : > { %s1120_s23 = sshra.s32 %s572_s30, 4  ;;  %s1121_s23 = int_to_ptr.hbm [resolvable:$true] %s1120_s23 }
 0x1e1   : > { %s1122_s7 = scalar_lea.hbm %s1121_s23, 16  ;;  %p1127_p10 = scmp.lt.s32.totalorder %s1121_s23, %s1816_s12 }
 0x1e2   : > { %p1123_p0 = scmp.ne.s32.totalorder %s1121_s23, %s1122_s7  ;;  %p1128_p2 = scmp.lt.s32.totalorder %s1126_s1, %s1122_s7 }
 0x1e4   : > { %p1124_p7 = pnand %p1123_p0, %p1508_p11  ;;  %p1129_p1 = por %p1128_p2, %p1127_p10 }
 0x1e6   : > { %p1125_p12 = pneg %p1124_p7 }
 0x1e8   : > { %p1130_p6 = pnand %p1129_p1, %p1125_p12 }
 0x1ea   : > { %1133 = shalt.err (!%p1130_p6)
}
 0x1eb   : > { %s1271_s19 = smov 384  }
 0x1ec   : > { %813 = dma.vmem_to_hbm [thread:$0]  (%p1508_p11), %s570_s0, 256, %s572_s30, %s538_s15, %s1269_s29, %s1271_s19, %s1270_s14  }
 0x1ed PF: > { %s1817_s13 = sld [smem:[#allocation21_spill]]  ;;  %p837_p9 = scmp.ge.s32.totalorder %s1264_s10, 2 }
 0x1ef   : > { %p830_p4 = pnand %p837_p9, %p1498_p3 }
 0x1f1   : > { %p831_p8 = pneg %p830_p4 }
 0x1f3   : > { %s586_s16 = sand.u32 1, %s1817_s13  }
 0x1f4   : > { %s587_s11 = scalar_lea.sflag [#allocation4], %s586_s16 }
 0x1f5   : > { %1203 = dma.done.wait (%p831_p8), %s587_s11, 256  }
 0x1f6   : > { %1205 = vsyncadd (%p831_p8), %s587_s11, 4294967040  ;;  %s1819_s2 = sld [smem:[#allocation18_spill]]  ;;  %p833_p5 = pnand %p837_p9, %p1518_p13 }
 0x1f8   : > { %p834_p0 = pneg %p833_p5 }
 0x1fc   : > { %s596_s21 = sand.u32 1, %s1819_s2  }
 0x1fd   : > { %s597_s17 = scalar_lea.sflag [#allocation12], %s596_s21 }
 0x1fe   : > { %1207 = dma.done.wait (%p834_p0), %s597_s17, 256  }
 0x1ff   : > { %1209 = vsyncadd (%p834_p0), %s597_s17, 4294967040  ;;  %s32_s10 = sadd.s32 1, %s1264_s10   ;;  %s1822_s14 = sld [smem:[#allocation19_spill]] }
 0x200   : > { %p1690_p11 = scmp.ge.s32.totalorder %s32_s10, 8   ;;  %s1823_s23 = sld [smem:[#allocation32_spill]] }
 0x201   : > { %s1824_s0 = sld [smem:[#allocation20_spill]]  ;;  %s1832_s21 = smov %s1216_s22 }
 0x202   : > { %s1825_s26 = sld [smem:[#allocation27_spill]]  ;;  %s1834_s24 = smov %s1228_s25 }
 0x203   : > { %s1826_s20 = sld [smem:[#allocation22_spill]]  ;;  %s1836_s27 = smov %s1240_s28 }
 0x204   : > { %s1827_s4 = sld [smem:[#allocation30_spill]]  ;;  %s1839_s30 = smov %s1256_s8 }
 0x205   : > { %s1828_s7 = sld [smem:[#allocation25_spill]]  ;;  %s1833_s22 = smov %s1822_s14 }
 0x206   : > { %s1829_s15 = sld [smem:[#allocation26_spill]] }
 0x207   : > { %s1830_s9 = sld [smem:[#allocation28_spill]]  ;;  %s1835_s25 = smov %s1824_s0 }
 0x208   :  { %31 = sbr.rel (!%p1690_p11) target bundleno = 23 (0x17), region = 147 }
 0x209   : > { %s1837_s28 = smov %s1826_s20 }
 0x20a   : > { %s1838_s29 = smov %s1827_s4 }
 0x20c   : > { %s1840_s8 = smov %s1829_s15 }
 0x20d   :  { %603 = vsyncpa [#allocation3], 1 }
 0x20e   :  { %605 = vsyncpa [#allocation3 + $0x1], 1 }
 0x20f   :  { %606 = vsyncpa [#allocation6], 1 }
 0x210   :  { %608 = vsyncpa [#allocation6 + $0x1], 1 }
 0x211   :  { %609 = vsyncpa [#allocation9], 1 }
 0x212   :  { %611 = vsyncpa [#allocation9 + $0x1], 1 }
 0x213   :  { %612 = vsyncpa [#allocation4], 1 }
 0x214   :  { %614 = vsyncpa [#allocation4 + $0x1], 1 }
 0x215   :  { %615 = vsyncpa [#allocation12], 1 }
 0x216   :  { %617 = vsyncpa [#allocation12 + $0x1], 1 }

</bundles_post_ra>
